<compile_context>
chip_gen: v6e
topology: v6e:2x2x1
jax: 0.10.0
libtpu: 0.0.40
codegen_flags: <defaults>
</compile_context>

<pallas_src>
import functools

import jax
import jax.numpy as jnp
from jax.experimental import pallas as pl
from jax.experimental.pallas import tpu as pltpu

_LANE = 128          # last-dim alignment (vreg lane width / MXU column tile)
_SMALL_M_MAX = 256   # grid-less fully-resident path up to this many rows
_ROW_TILE = 256      # row-tile size for the gridded (large batch) path


def _round_up(x, m):
    return (x + m - 1) // m * m


def _apply_act(h, act):
    if act == "relu":
        return jnp.maximum(h, 0.0)
    if act == "tanh":
        return jnp.tanh(h)
    if act == "identity":
        return h
    raise ValueError(f"unknown act: {act}")


@functools.lru_cache(maxsize=1)
def _vmem_capacity_bytes():
    try:
        cap = getattr(pltpu.get_tpu_info(), "vmem_capacity_bytes", None)
        if cap:
            return int(cap)
    except Exception:
        pass
    return 64 * 1024 * 1024  # conservative default (v7x per-TC VMEM)


def _fused_mlp_kernel(*refs, n_layers, act):
    """refs = (x_ref, w_0, b_0, ..., w_{L-1}, b_{L-1}, o_ref).

    Weights/biases and activations are VMEM-resident; the layer loop is
    unrolled at trace time into a straight chain of MXU dots with a
    bias + activation epilogue per layer (f32 accumulation throughout).
    """
    x_ref = refs[0]
    o_ref = refs[-1]
    wb = refs[1:-1]

    h = x_ref[...]                                    # f32 rows
    for i in range(n_layers):
        w = wb[2 * i][...]                            # (K_i, N_i) pre-transposed, N padded
        b = wb[2 * i + 1][...]                        # (1, N_i) f32
        acc = jnp.dot(h.astype(w.dtype), w, preferred_element_type=jnp.float32)
        h = _apply_act(acc + b, act)
    o_ref[...] = h.astype(o_ref.dtype)


def prepare_params(params, *, mean=0.0, std=1.0, weights_dtype=jnp.float32):
    """One-time parameter preparation (call once at init, NOT per forward pass).

      * folds (x - mean) / std into the first Linear (scalar or per-feature
        mean/std of length = flattened input dim)
      * transposes every weight from PyTorch (out, in) to (in, out) = (K, N)
      * zero-pads N to a multiple of 128; K of layer 0 stays un-padded so the
        flattened input can be fed directly, later K's pad to the previous
        padded N (padded rows are zero, so results are unchanged)
      * optionally stores weights in bfloat16 (f32 accumulation in-kernel)

    Returns (layers, out_features) with layers = [(w_(Kp,Np), b_(1,Np)), ...].
    """
    layers = []
    for idx, (w, b) in enumerate(params):
        wt = jnp.asarray(w, jnp.float32).T            # (K, N)
        bb = jnp.asarray(b, jnp.float32)
        K, N = wt.shape
        if idx == 0:
            inv_std = 1.0 / jnp.broadcast_to(
                jnp.asarray(std, jnp.float32).reshape(-1), (K,))
            mean_v = jnp.broadcast_to(
                jnp.asarray(mean, jnp.float32).reshape(-1), (K,))
            bb = bb - (mean_v * inv_std) @ wt
            wt = wt * inv_std[:, None]
            Kp = K                                    # feed x un-padded
        else:
            Kp = _round_up(K, _LANE)                  # == previous padded N
        Np = _round_up(N, _LANE)
        wt_p = jnp.zeros((Kp, Np), jnp.float32).at[:K, :N].set(wt).astype(weights_dtype)
        b_p = jnp.zeros((1, Np), jnp.float32).at[0, :N].set(bb)
        layers.append((wt_p, b_p))
    out_features = int(params[-1][0].shape[0])
    return layers, out_features


@functools.partial(jax.jit, static_argnames=("out_features", "act"))
def fully_connected_forward(x, layers, *, out_features, act="relu"):
    """x: (B, C, H, W) NCHW (any (B, ...) works). Returns (B, out_features).

    NOTE: batching many inputs into one call (B >= 128..256) is the biggest
    throughput lever — it amortizes the per-call weight DMA and fills MXU rows.
    """
    B = x.shape[0]
    x2 = jnp.asarray(x, jnp.float32).reshape(B, -1)   # nn.Flatten(); norm folded into layer 0
    M, K = x2.shape
    assert K == layers[0][0].shape[0], (K, layers[0][0].shape[0])

    flat = [a for wb in layers for a in wb]
    Np_last = layers[-1][0].shape[1]
    n_layers = len(layers)
    kernel = functools.partial(_fused_mlp_kernel, n_layers=n_layers, act=act)

    # --- VMEM accounting: params + per-layer activation blocks + pipeline I/O buffers.
    small = M <= _SMALL_M_MAX
    rows = M if small else _ROW_TILE
    param_bytes = sum(int(a.size) * a.dtype.itemsize for a in flat)
    widths = [K] + [int(w.shape[1]) for (w, _) in layers]
    act_bytes = 4 * rows * sum(widths)                # x block + every layer's output block
    io_bytes = 4 * rows * (K + int(Np_last))          # extra double-buffer for streamed x / out
    total_bytes = param_bytes + act_bytes + io_bytes
    vmem_cap = _vmem_capacity_bytes()
    budget = int(0.75 * vmem_cap)                     # 25% headroom for compiler scratch
    # TODO(synk): for parameter sets exceeding `budget`, stream the oversized weight
    # layers from HBM (memory_space=pl.ANY + pltpu.emit_pipeline) inside this same
    # fused kernel instead of asserting, keeping activations VMEM-resident.
    assert total_bytes <= budget, (total_bytes, budget)
    vmem_limit = int(min(0.9 * vmem_cap, max(2 * total_bytes, 16 * 1024 * 1024)))

    if small:
        # Grid-less: full-array BlockSpecs (exempt from (8,128) divisibility),
        # no host-side padding/copies of x at all.
        out = pl.pallas_call(
            kernel,
            out_shape=jax.ShapeDtypeStruct((M, Np_last), jnp.float32),
            in_specs=[pl.BlockSpec(memory_space=pltpu.MemorySpace.VMEM)] * (1 + len(flat)),
            out_specs=pl.BlockSpec(memory_space=pltpu.MemorySpace.VMEM),
            compiler_params=pltpu.CompilerParams(vmem_limit_bytes=vmem_limit),
        )(x2, *flat)
    else:
        # 1-D grid over row tiles; weights/biases use a constant index_map so they
        # stay VMEM-resident across the whole grid; x/out tiles pipeline behind
        # compute; "parallel" lets v7x shard row tiles across both TensorCores.
        tm = _ROW_TILE
        in_specs = [pl.BlockSpec((tm, K), lambda i: (i, 0))]
        for w, b in layers:
            in_specs.append(pl.BlockSpec(w.shape, lambda i: (0, 0)))
            in_specs.append(pl.BlockSpec(b.shape, lambda i: (0, 0)))
        out = pl.pallas_call(
            kernel,
            out_shape=jax.ShapeDtypeStruct((M, Np_last), jnp.float32),
            grid=(pl.cdiv(M, tm),),
            in_specs=in_specs,
            out_specs=pl.BlockSpec((tm, Np_last), lambda i: (i, 0)),
            compiler_params=pltpu.CompilerParams(
                dimension_semantics=("parallel",),
                vmem_limit_bytes=vmem_limit),
        )(x2, *flat)

    return out[:, :out_features]


def init_params(sizes, key):
    """Deterministic PyTorch-Linear-style init: U(-1/sqrt(fan_in), 1/sqrt(fan_in))."""
    params = []
    for i in range(len(sizes) - 1):
        key, kw, kb = jax.random.split(key, 3)
        bound = 1.0 / (sizes[i] ** 0.5)
        w = jax.random.uniform(kw, (sizes[i + 1], sizes[i]),
                               minval=-bound, maxval=bound, dtype=jnp.float32)
        b = jax.random.uniform(kb, (sizes[i + 1],),
                               minval=-bound, maxval=bound, dtype=jnp.float32)
        params.append((w, b))
    return params


def _reference(x, params, mean, std, act):
    h = (x - mean) / std                              # module normalizes before Flatten
    h = h.reshape(h.shape[0], -1)
    for (w, b) in params:
        h = _apply_act(h @ w.T + b, act)
    return h


if __name__ == "__main__":
    key = jax.random.PRNGKey(0)
    kx, kp = jax.random.split(key)

    # Shapes consistent with the module: NCHW input flattened to 4*16*16 = 1024.
    B, C, H, W = 2, 4, 16, 16
    sizes = [C * H * W, 64, 32]
    mean, std = 0.5, 2.0

    x = jax.random.normal(kx, (B, C, H, W), dtype=jnp.float32)
    params = init_params(sizes, kp)

    # One-time preparation (fold normalization, transpose, pad).
    layers_f32, out_dim = prepare_params(params, mean=mean, std=std)

    # Small-batch grid-less path: relu (the module's act_fn), plus tanh/identity.
    for act in ("relu", "tanh", "identity"):
        out = jax.block_until_ready(
            fully_connected_forward(x, layers_f32, out_features=out_dim, act=act))
        ref = _reference(x, params, mean, std, act)
        assert out.shape == (B, sizes[-1]), out.shape
        assert jnp.allclose(out, ref, atol=1e-4, rtol=1e-4), f"mismatch (act={act})"

    # Large-batch path: row-tiled grid with VMEM-resident weights (megacore parallel).
    Bbig = 512
    xb = jax.random.normal(jax.random.PRNGKey(1), (Bbig, C, H, W), dtype=jnp.float32)
    outb = jax.block_until_ready(
        fully_connected_forward(xb, layers_f32, out_features=out_dim, act="relu"))
    refb = _reference(xb, params, mean, std, "relu")
    assert outb.shape == (Bbig, sizes[-1]), outb.shape
    assert jnp.allclose(outb, refb, atol=1e-4, rtol=1e-4), "mismatch (gridded path)"

    # Optional bf16-weight path (halves weight VMEM / DMA, f32 accumulation).
    layers_bf16, _ = prepare_params(params, mean=mean, std=std,
                                    weights_dtype=jnp.bfloat16)
    outh = jax.block_until_ready(
        fully_connected_forward(x, layers_bf16, out_features=out_dim, act="relu"))
    refh = _reference(x, params, mean, std, "relu")
    assert jnp.allclose(outh, refh, atol=5e-2, rtol=5e-2), "mismatch (bf16 weights)"

    print("KERNEL_OK")
</pallas_src>

<mosaic_0001>
module attributes {stable_mosaic.version = 11 : i64} {
  func.func @_fused_mlp_kernel(%arg0: memref<2x1024xf32, #tpu.memory_space<vmem>>, %arg1: memref<1024x128xf32, #tpu.memory_space<vmem>>, %arg2: memref<1x128xf32, #tpu.memory_space<vmem>>, %arg3: memref<128x128xf32, #tpu.memory_space<vmem>>, %arg4: memref<1x128xf32, #tpu.memory_space<vmem>>, %arg5: memref<2x128xf32, #tpu.memory_space<vmem>>) attributes {dimension_semantics = [], scalar_prefetch = 0 : i64, scratch_operands = 0 : i64, tpu.core_type = #tpu.core_type<tc>} {
    %c0 = arith.constant 0 : index
    %c0_0 = arith.constant 0 : index
    %0 = vector.load %arg0[%c0, %c0_0] : memref<2x1024xf32, #tpu.memory_space<vmem>>, vector<2x1024xf32>
    %c0_1 = arith.constant 0 : index
    %c0_2 = arith.constant 0 : index
    %1 = vector.load %arg1[%c0_1, %c0_2] : memref<1024x128xf32, #tpu.memory_space<vmem>>, vector<1024x128xf32>
    %c0_3 = arith.constant 0 : index
    %c0_4 = arith.constant 0 : index
    %2 = vector.load %arg2[%c0_3, %c0_4] : memref<1x128xf32, #tpu.memory_space<vmem>>, vector<1x128xf32>
    %cst = arith.constant dense<0.000000e+00> : vector<2x128xf32>
    %3 = tpu.matmul %0, %1, %cst {dimension_numbers = #tpu.dot_dimension_numbers<[1], [0], [0], [1], [0, 0, 1, 1], [], []>} : vector<2x1024xf32>, vector<1024x128xf32>, vector<2x128xf32> -> vector<2x128xf32>
    %4 = vector.broadcast %2 : vector<1x128xf32> to vector<2x128xf32>
    %5 = arith.addf %3, %4 : vector<2x128xf32>
    %cst_5 = arith.constant 0.000000e+00 : f32
    %6 = vector.broadcast %cst_5 : f32 to vector<2x128xf32>
    %7 = arith.maximumf %5, %6 : vector<2x128xf32>
    %c0_6 = arith.constant 0 : index
    %c0_7 = arith.constant 0 : index
    %8 = vector.load %arg3[%c0_6, %c0_7] : memref<128x128xf32, #tpu.memory_space<vmem>>, vector<128x128xf32>
    %c0_8 = arith.constant 0 : index
    %c0_9 = arith.constant 0 : index
    %9 = vector.load %arg4[%c0_8, %c0_9] : memref<1x128xf32, #tpu.memory_space<vmem>>, vector<1x128xf32>
    %cst_10 = arith.constant dense<0.000000e+00> : vector<2x128xf32>
    %10 = tpu.matmul %7, %8, %cst_10 {dimension_numbers = #tpu.dot_dimension_numbers<[1], [0], [0], [1], [0, 0, 1, 1], [], []>} : vector<2x128xf32>, vector<128x128xf32>, vector<2x128xf32> -> vector<2x128xf32>
    %11 = vector.broadcast %9 : vector<1x128xf32> to vector<2x128xf32>
    %12 = arith.addf %10, %11 : vector<2x128xf32>
    %cst_11 = arith.constant 0.000000e+00 : f32
    %13 = vector.broadcast %cst_11 : f32 to vector<2x128xf32>
    %14 = arith.maximumf %12, %13 : vector<2x128xf32>
    %c0_12 = arith.constant 0 : index
    %c0_13 = arith.constant 0 : index
    %15 = vector.load %arg5[%c0_12, %c0_13] : memref<2x128xf32, #tpu.memory_space<vmem>>, vector<2x128xf32>
    tpu.vector_store %arg5[%c0_12, %c0_13], %14 {strides = array<i32>} : memref<2x128xf32, #tpu.memory_space<vmem>>, vector<2x128xf32>,
    return
  }
}

</mosaic_0001>

<bundles_post_ra>
// kernel: fully_connected_forward.1
= control target key start
LH: loop header
LB: loop body
LE: loop exit
PB: predicated region body
PF: predicated region fallthrough
CT: control target
= control target key end

     0   :  { %10 = vsyncpa [#allocation3], 0  ;;  %s963_s0 = inlined_call_operand.vmem [shape: f32[2,1024], index: 0, kind: input, shape index: {}]   ;;  %s964_s1 = inlined_call_operand.hbm [shape: f32[1024,128], index: 1, kind: input, shape index: {}]   ;;  %s965_s2 = inlined_call_operand.vmem [shape: f32[1,128], index: 2, kind: input, shape index: {}]   ;;  %s966_s3 = inlined_call_operand.vmem [shape: f32[128,128], index: 3, kind: input, shape index: {}]   ;;  %s967_s4 = inlined_call_operand.vmem [shape: f32[1,128], index: 4, kind: input, shape index: {}]   ;;  %s968_s5 = inlined_call_operand.hbm [shape: f32[2,128], index: 5, kind: output, shape index: {}]  }
   0x1   :  { %11 = vsyncpa [#allocation4], 0  ;;  %s854_s18 = smov [#allocation2]  }
   0x2   :  { %s19_s19 = sshll.u32 %s854_s18, 4  ;;  %s20_s19 = int_to_ptr.vmem [resolvable:$true] %s19_s19 }
   0x3   :  { %s818_s20 = scalar_lea.vmem %s20_s19, 16384  ;;  %p823_p1 = scmp.lt.s32.totalorder %s20_s19, %s20_s19 }
   0x4   :  { %p819_p0 = scmp.ne.s32.totalorder %s20_s19, %s818_s20  ;;  %p824_p2 = scmp.lt.s32.totalorder %s818_s20, %s818_s20 }
   0x6   :  { %p825_p3 = por %p824_p2, %p823_p1 }
   0x8   :  { %p826_p4 = pnand %p825_p3, %p819_p0 }
   0xa   :  { %829 = shalt.err (!%p826_p4)
}
   0xb   :  { %s855_s21 = smov 128   ;;  %s856_s22 = smov 8  }
   0xc   :  { %25 = dma.hbm_to_vmem [thread:$0]  %s964_s1, 16384, %s20_s19, [#allocation3], %s855_s21, %s855_s21, %s856_s22  }
   0xd   :  { %850 = dma.done.wait [#allocation3], 16384  }
   0xe   :  { %851 = vsyncadd [#allocation3], 4294950912  ;;  %v68_v0 = vld [vmem:[#allocation2 + $0xf8] sm:$0xff]  ;;  %v67_v4 = vld [vmem:[#allocation2 + $0xf0] sm:$0xff]  ;;  %v857_v30 = vmov 1983009808   ;;  %v178_v32 = vlaneseq }
   0xf   :  { %v100_v1 = vld [vmem:[#allocation2 + $0x1f8] sm:$0xff]  ;;  %609 = vmatprep.subr.mxu0 %v68_v0  ;;  %v99_v5 = vld [vmem:[#allocation2 + $0x1f0] sm:$0xff]  ;;  %v66_v8 = vld [vmem:[#allocation2 + $0xe8] sm:$0xff]  ;;  %v176_v31 = vunpack.c.l.s4 %v857_v30  ;;  %vm859_vm0 = vmmov 0  }
  0x10   :  { %v52_v2 = vld [vmem:[#allocation2 + $0x78] sm:$0xff]  ;;  %644 = vmatprep.subr.mxu1 %v100_v1  ;;  %v51_v6 = vld [vmem:[#allocation2 + $0x70] sm:$0xff]  ;;  %v98_v9 = vld [vmem:[#allocation2 + $0x1e8] sm:$0xff]  ;;  %v179_v42 = vshrl.u32 %v178_v32, 7 }
  0x11   :  { %v84_v3 = vld [vmem:[#allocation2 + $0x178] sm:$0xff]  ;;  %610 = vmatpush3.msra.mxu0 %v52_v2  ;;  %v83_v7 = vld [vmem:[#allocation2 + $0x170] sm:$0xff]  ;;  %v50_v10 = vld [vmem:[#allocation2 + $0x68] sm:$0xff]  ;;  %v177_v41 = vunpack.c.0.s8 %v176_v31 }
  0x12   :  { %645 = vmatpush3.msra.mxu1 %v84_v3  ;;  %611 = vmatprep.subr.mxu0 %v67_v4  ;;  %v82_v11 = vld [vmem:[#allocation2 + $0x168] sm:$0xff]  ;;  %v65_v12 = vld [vmem:[#allocation2 + $0xe0] sm:$0xff]  ;;  %v64_v16 = vld [vmem:[#allocation2 + $0xd8] sm:$0xff] }
  0x13   :  { %646 = vmatprep.subr.mxu1 %v99_v5  ;;  %612 = vmatpush3.msra.mxu0 %v51_v6  ;;  %v97_v13 = vld [vmem:[#allocation2 + $0x1e0] sm:$0xff]  ;;  %v96_v17 = vld [vmem:[#allocation2 + $0x1d8] sm:$0xff]  ;;  %v63_v20 = vld [vmem:[#allocation2 + $0xd0] sm:$0xff]  ;;  %v894_v51 = vsub.s32 %v177_v41, %v179_v42 }
  0x14   :  { %647 = vmatpush3.msra.mxu1 %v83_v7  ;;  %613 = vmatprep.subr.mxu0 %v66_v8  ;;  %v49_v14 = vld [vmem:[#allocation2 + $0x60] sm:$0xff]  ;;  %v48_v18 = vld [vmem:[#allocation2 + $0x58] sm:$0xff]  ;;  %v95_v21 = vld [vmem:[#allocation2 + $0x1d0] sm:$0xff] }
  0x15   :  { %648 = vmatprep.subr.mxu1 %v98_v9  ;;  %v81_v15 = vld [vmem:[#allocation2 + $0x160] sm:$0xff]  ;;  %614 = vmatpush3.msra.mxu0 %v50_v10  ;;  %v80_v19 = vld [vmem:[#allocation2 + $0x158] sm:$0xff]  ;;  %v47_v22 = vld [vmem:[#allocation2 + $0x50] sm:$0xff] }
  0x16   :  { %649 = vmatpush3.msra.mxu1 %v82_v11  ;;  %615 = vmatprep.subr.mxu0 %v65_v12  ;;  %v79_v23 = vld [vmem:[#allocation2 + $0x150] sm:$0xff]  ;;  %v62_v24 = vld [vmem:[#allocation2 + $0xc8] sm:$0xff]  ;;  %v61_v28 = vld [vmem:[#allocation2 + $0xc0] sm:$0xff] }
  0x17   :  { %650 = vmatprep.subr.mxu1 %v97_v13  ;;  %616 = vmatpush3.msra.mxu0 %v49_v14  ;;  %v94_v25 = vld [vmem:[#allocation2 + $0x1c8] sm:$0xff]  ;;  %v93_v29 = vld [vmem:[#allocation2 + $0x1c0] sm:$0xff]  ;;  %v60_v35 = vld [vmem:[#allocation2 + $0xb8] sm:$0xff] }
  0x18   :  { %651 = vmatpush3.msra.mxu1 %v81_v15  ;;  %617 = vmatprep.subr.mxu0 %v64_v16  ;;  %v46_v26 = vld [vmem:[#allocation2 + $0x48] sm:$0xff]  ;;  %v45_v33 = vld [vmem:[#allocation2 + $0x40] sm:$0xff]  ;;  %v92_v36 = vld [vmem:[#allocation2 + $0x1b8] sm:$0xff] }
  0x19   :  { %652 = vmatprep.subr.mxu1 %v96_v17  ;;  %618 = vmatpush3.msra.mxu0 %v48_v18  ;;  %v78_v27 = vld [vmem:[#allocation2 + $0x148] sm:$0xff]  ;;  %v77_v34 = vld [vmem:[#allocation2 + $0x140] sm:$0xff]  ;;  %v44_v37 = vld [vmem:[#allocation2 + $0x38] sm:$0xff] }
  0x1a   :  { %653 = vmatpush3.msra.mxu1 %v80_v19  ;;  %619 = vmatprep.subr.mxu0 %v63_v20  ;;  %v76_v38 = vld [vmem:[#allocation2 + $0x138] sm:$0xff]  ;;  %v59_v39 = vld [vmem:[#allocation2 + $0xb0] sm:$0xff]  ;;  %v58_v45 = vld [vmem:[#allocation2 + $0xa8] sm:$0xff] }
  0x1b   :  { %654 = vmatprep.subr.mxu1 %v95_v21  ;;  %620 = vmatpush3.msra.mxu0 %v47_v22  ;;  %v91_v40 = vld [vmem:[#allocation2 + $0x1b0] sm:$0xff]  ;;  %v90_v46 = vld [vmem:[#allocation2 + $0x1a8] sm:$0xff]  ;;  %v57_v49 = vld [vmem:[#allocation2 + $0xa0] sm:$0xff] }
  0x1c   :  { %655 = vmatpush3.msra.mxu1 %v79_v23  ;;  %621 = vmatprep.subr.mxu0 %v62_v24  ;;  %v43_v43 = vld [vmem:[#allocation2 + $0x30] sm:$0xff]  ;;  %v42_v47 = vld [vmem:[#allocation2 + $0x28] sm:$0xff]  ;;  %v89_v50 = vld [vmem:[#allocation2 + $0x1a0] sm:$0xff] }
  0x1d   :  { %656 = vmatprep.subr.mxu1 %v94_v25  ;;  %622 = vmatpush3.msra.mxu0 %v46_v26  ;;  %v75_v44 = vld [vmem:[#allocation2 + $0x130] sm:$0xff]  ;;  %v74_v48 = vld [vmem:[#allocation2 + $0x128] sm:$0xff]  ;;  %v41_v52 = vld [vmem:[#allocation2 + $0x20] sm:$0xff] }
  0x1e   :  { %657 = vmatpush3.msra.mxu1 %v78_v27  ;;  %623 = vmatprep.subr.mxu0 %v61_v28  ;;  %v73_v53 = vld [vmem:[#allocation2 + $0x120] sm:$0xff]  ;;  %v56_v55 = vld [vmem:[#allocation2 + $0x98] sm:$0xff]  ;;  %v55_v60 = vld [vmem:[#allocation2 + $0x90] sm:$0xff] }
  0x1f   :  { %658 = vmatprep.subr.mxu1 %v93_v29  ;;  %624 = vmatpush3.msra.mxu0 %v45_v33  ;;  %v35_v54 = vld [vmem:[%s963_s0] sm:$0xff]  ;;  %v88_v56 = vld [vmem:[#allocation2 + $0x198] sm:$0xff]  ;;  %v87_v61 = vld [vmem:[#allocation2 + $0x190] sm:$0xff] }
  0x20   :  { %659 = vmatpush3.msra.mxu1 %v77_v34  ;;  %625 = vmatprep.subr.mxu0 %v60_v35  ;;  %v174_v57 = vcombine.high %v35_v54, %v35_v54  ;;  %v40_v58 = vld [vmem:[#allocation2 + $0x18] sm:$0xff]  ;;  %v181_v62 = vrot.slane %v35_v54, %v894_v51  ;;  %v39_v63 = vld [vmem:[#allocation2 + $0x10] sm:$0xff]  ;;  %v54_v1 = vld [vmem:[#allocation2 + $0x88] sm:$0xff] }
  0x21   :  { %660 = vmatprep.subr.mxu1 %v92_v36  ;;  %626 = vmatpush3.msra.mxu0 %v44_v37  ;;  %v72_v59 = vld [vmem:[#allocation2 + $0x118] sm:$0xff]  ;;  %v71_v0 = vld [vmem:[#allocation2 + $0x110] sm:$0xff]  ;;  %v86_v2 = vld [vmem:[#allocation2 + $0x188] sm:$0xff] }
  0x22   :  { %661 = vmatpush3.msra.mxu1 %v76_v38  ;;  %627 = vmatprep.subr.mxu0 %v59_v39  ;;  %v188_v3 = vrot.slane %v174_v57, %v894_v51  ;;  %v38_v4 = vld [vmem:[#allocation2 + $0x8] sm:$0xff]  ;;  %v53_v6 = vld [vmem:[#allocation2 + $0x80] sm:$0xff]  ;;  %v189_v8 = vcombine.high %v181_v62, %v181_v62  ;;  %v132_v12 = vld [vmem:[#allocation2 + $0x2f8] sm:$0xff] }
  0x23   :  { %662 = vmatprep.subr.mxu1 %v91_v40  ;;  %628 = vmatpush3.msra.mxu0 %v43_v43  ;;  %v70_v5 = vld [vmem:[#allocation2 + $0x108] sm:$0xff]  ;;  %v85_v7 = vld [vmem:[#allocation2 + $0x180] sm:$0xff]  ;;  %v164_v13 = vld [vmem:[#allocation2 + $0x3f8] sm:$0xff] }
  0x24   :  { %663 = vmatpush3.msra.mxu1 %v75_v44  ;;  %629 = vmatprep.subr.mxu0 %v58_v45  ;;  %v37_v9 = vld [vmem:[#allocation2] sm:$0xff]  ;;  %v190_v11 = vcombine.high %v188_v3, %v188_v3  ;;  %v116_v14 = vld [vmem:[#allocation2 + $0x278] sm:$0xff]  ;;  %v131_v16 = vld [vmem:[#allocation2 + $0x2f0] sm:$0xff] }
  0x25   :  { %664 = vmatprep.subr.mxu1 %v90_v46  ;;  %630 = vmatpush3.msra.mxu0 %v42_v47  ;;  %v69_v10 = vld [vmem:[#allocation2 + $0x100] sm:$0xff]  ;;  %v148_v15 = vld [vmem:[#allocation2 + $0x378] sm:$0xff]  ;;  %v163_v17 = vld [vmem:[#allocation2 + $0x3f0] sm:$0xff] }
  0x26   :  { %665 = vmatpush3.msra.mxu1 %v74_v48  ;;  %631 = vmatprep.subr.mxu0 %v57_v49  ;;  %v115_v18 = vld [vmem:[#allocation2 + $0x270] sm:$0xff]  ;;  %v130_v20 = vld [vmem:[#allocation2 + $0x2e8] sm:$0xff]  ;;  %v129_v24 = vld [vmem:[#allocation2 + $0x2e0] sm:$0xff] }
  0x27   :  { %666 = vmatprep.subr.mxu1 %v89_v50  ;;  %632 = vmatpush3.msra.mxu0 %v41_v52  ;;  %v147_v19 = vld [vmem:[#allocation2 + $0x370] sm:$0xff]  ;;  %v162_v21 = vld [vmem:[#allocation2 + $0x3e8] sm:$0xff]  ;;  %v161_v25 = vld [vmem:[#allocation2 + $0x3e0] sm:$0xff] }
  0x28   :  { %667 = vmatpush3.msra.mxu1 %v73_v53  ;;  %633 = vmatprep.subr.mxu0 %v56_v55  ;;  %v114_v22 = vld [vmem:[#allocation2 + $0x268] sm:$0xff]  ;;  %v113_v26 = vld [vmem:[#allocation2 + $0x260] sm:$0xff]  ;;  %v128_v28 = vld [vmem:[#allocation2 + $0x2d8] sm:$0xff] }
  0x29   :  { %668 = vmatprep.subr.mxu1 %v88_v56  ;;  %634 = vmatpush3.msra.mxu0 %v40_v58  ;;  %v146_v23 = vld [vmem:[#allocation2 + $0x368] sm:$0xff]  ;;  %v145_v27 = vld [vmem:[#allocation2 + $0x360] sm:$0xff]  ;;  %v160_v29 = vld [vmem:[#allocation2 + $0x3d8] sm:$0xff] }
  0x2a   :  { %669 = vmatpush3.msra.mxu1 %v72_v59  ;;  %635 = vmatprep.subr.mxu0 %v55_v60  ;;  %v112_v30 = vld [vmem:[#allocation2 + $0x258] sm:$0xff]  ;;  %v127_v32 = vld [vmem:[#allocation2 + $0x2d0] sm:$0xff]  ;;  %v126_v36 = vld [vmem:[#allocation2 + $0x2c8] sm:$0xff] }
  0x2b   :  { %670 = vmatprep.subr.mxu1 %v87_v61  ;;  %636 = vmatpush3.msra.mxu0 %v39_v63  ;;  %v144_v31 = vld [vmem:[#allocation2 + $0x358] sm:$0xff]  ;;  %v159_v33 = vld [vmem:[#allocation2 + $0x3d0] sm:$0xff]  ;;  %v158_v37 = vld [vmem:[#allocation2 + $0x3c8] sm:$0xff] }
  0x2c   :  { %671 = vmatpush3.msra.mxu1 %v71_v0  ;;  %637 = vmatprep.subr.mxu0 %v54_v1  ;;  %v111_v34 = vld [vmem:[#allocation2 + $0x250] sm:$0xff]  ;;  %v110_v38 = vld [vmem:[#allocation2 + $0x248] sm:$0xff]  ;;  %v125_v40 = vld [vmem:[#allocation2 + $0x2c0] sm:$0xff] }
  0x2d   :  { %672 = vmatprep.subr.mxu1 %v86_v2  ;;  %638 = vmatpush3.msra.mxu0 %v38_v4  ;;  %v143_v35 = vld [vmem:[#allocation2 + $0x350] sm:$0xff]  ;;  %v142_v39 = vld [vmem:[#allocation2 + $0x348] sm:$0xff]  ;;  %v157_v41 = vld [vmem:[#allocation2 + $0x3c0] sm:$0xff] }
  0x2e   :  { %673 = vmatpush3.msra.mxu1 %v70_v5  ;;  %639 = vmatprep.subr.mxu0 %v53_v6  ;;  %v109_v42 = vld [vmem:[#allocation2 + $0x240] sm:$0xff]  ;;  %v124_v44 = vld [vmem:[#allocation2 + $0x2b8] sm:$0xff]  ;;  %v123_v48 = vld [vmem:[#allocation2 + $0x2b0] sm:$0xff] }
  0x2f   :  { %674 = vmatprep.subr.mxu1 %v85_v7  ;;  %640 = vmatpush3.msra.mxu0 %v37_v9  ;;  %v141_v43 = vld [vmem:[#allocation2 + $0x340] sm:$0xff]  ;;  %v156_v45 = vld [vmem:[#allocation2 + $0x3b8] sm:$0xff]  ;;  %v155_v49 = vld [vmem:[#allocation2 + $0x3b0] sm:$0xff] }
  0x30   :  { %280 = vmatprep.mubr.f32.mxu0 %v189_v8  ;;  %675 = vmatpush3.msra.mxu1 %v69_v10  ;;  %v108_v46 = vld [vmem:[#allocation2 + $0x238] sm:$0xff]  ;;  %v107_v50 = vld [vmem:[#allocation2 + $0x230] sm:$0xff]  ;;  %v122_v53 = vld [vmem:[#allocation2 + $0x2a8] sm:$0xff] }
  0x31   :  { %281 = vmatmul.mubr.f32.vlgmr.msra.gmra.mxu0 %v181_v62  ;;  %350 = vmatprep.mubr.f32.mxu1 %v190_v11  ;;  %v140_v47 = vld [vmem:[#allocation2 + $0x338] sm:$0xff]  ;;  %v139_v52 = vld [vmem:[#allocation2 + $0x330] sm:$0xff]  ;;  %v154_v54 = vld [vmem:[#allocation2 + $0x3a8] sm:$0xff] }
  0x32   :  { %679 = vmatprep.subr.mxu0 %v132_v12  ;;  %714 = vmatprep.subr.mxu1 %v164_v13  ;;  %v36_v55 = vld [vmem:[%s963_s0 + $0x8] sm:$0xff]  ;;  %v121_v58 = vld [vmem:[#allocation2 + $0x2a0] sm:$0xff]  ;;  %v120_v63 = vld [vmem:[#allocation2 + $0x298] sm:$0xff] }
  0x33   :  { %351 = vmatmul.mubr.f32.vlgmr.msra.gmra.mxu1 %v188_v3  ;;  %680 = vmatpush3.msra.mxu0 %v116_v14  ;;  %v106_v56 = vld [vmem:[#allocation2 + $0x228] sm:$0xff]  ;;  %v153_v59 = vld [vmem:[#allocation2 + $0x3a0] sm:$0xff]  ;;  %v191_v62 = vcombine.high %v36_v55, %v36_v55  ;;  %v152_v0 = vld [vmem:[#allocation2 + $0x398] sm:$0xff]  ;;  %v198_v5 = vrot.slane %v36_v55, %v894_v51 }
  0x34   :  { %715 = vmatpush3.msra.mxu1 %v148_v15  ;;  %681 = vmatprep.subr.mxu0 %v131_v16  ;;  %v138_v57 = vld [vmem:[#allocation2 + $0x328] sm:$0xff]  ;;  %v105_v60 = vld [vmem:[#allocation2 + $0x220] sm:$0xff]  ;;  %v104_v1 = vld [vmem:[#allocation2 + $0x218] sm:$0xff] }
  0x35   :  { %716 = vmatprep.subr.mxu1 %v163_v17  ;;  %682 = vmatpush3.msra.mxu0 %v115_v18  ;;  %v137_v61 = vld [vmem:[#allocation2 + $0x320] sm:$0xff]  ;;  %v136_v2 = vld [vmem:[#allocation2 + $0x318] sm:$0xff]  ;;  %v119_v3 = vld [vmem:[#allocation2 + $0x290] sm:$0xff]  ;;  %v205_v8 = vrot.slane %v191_v62, %v894_v51  ;;  %v206_v15 = vcombine.high %v198_v5, %v198_v5 }
  0x36   :  { %717 = vmatpush3.msra.mxu1 %v147_v19  ;;  %683 = vmatprep.subr.mxu0 %v130_v20  ;;  %v151_v4 = vld [vmem:[#allocation2 + $0x390] sm:$0xff]  ;;  %v118_v9 = vld [vmem:[#allocation2 + $0x288] sm:$0xff]  ;;  %v117_v13 = vld [vmem:[#allocation2 + $0x280] sm:$0xff]  ;;  %v858_v19 = vmov 0.0  }
  0x37   :  { %718 = vmatprep.subr.mxu1 %v162_v21  ;;  %684 = vmatpush3.msra.mxu0 %v114_v22  ;;  %v103_v6 = vld [vmem:[#allocation2 + $0x210] sm:$0xff]  ;;  %v150_v10 = vld [vmem:[#allocation2 + $0x388] sm:$0xff]  ;;  %v149_v14 = vld [vmem:[#allocation2 + $0x380] sm:$0xff]  ;;  %v207_v17 = vcombine.high %v205_v8, %v205_v8 }
  0x38   :  { %719 = vmatpush3.msra.mxu1 %v146_v23  ;;  %685 = vmatprep.subr.mxu0 %v129_v24  ;;  %v135_v7 = vld [vmem:[#allocation2 + $0x310] sm:$0xff]  ;;  %v102_v11 = vld [vmem:[#allocation2 + $0x208] sm:$0xff]  ;;  %v101_v16 = vld [vmem:[#allocation2 + $0x200] sm:$0xff] }
  0x39   :  { %720 = vmatprep.subr.mxu1 %v161_v25  ;;  %686 = vmatpush3.msra.mxu0 %v113_v26  ;;  %v134_v12 = vld [vmem:[#allocation2 + $0x308] sm:$0xff]  ;;  %v133_v51 = vld [vmem:[#allocation2 + $0x300] sm:$0xff]  ;;  %v512_v18 = vld [vmem:[%s966_s3 + $0x78] sm:$0xff] }
  0x3a   :  { %721 = vmatpush3.msra.mxu1 %v145_v27  ;;  %687 = vmatprep.subr.mxu0 %v128_v28  ;;  %v511_v20 = vld [vmem:[%s966_s3 + $0x70] sm:$0xff]  ;;  %v510_v21 = vld [vmem:[%s966_s3 + $0x68] sm:$0xff]  ;;  %v509_v22 = vld [vmem:[%s966_s3 + $0x60] sm:$0xff] }
  0x3b   :  { %722 = vmatprep.subr.mxu1 %v160_v29  ;;  %688 = vmatpush3.msra.mxu0 %v112_v30  ;;  %v508_v23 = vld [vmem:[%s966_s3 + $0x58] sm:$0xff]  ;;  %v507_v24 = vld [vmem:[%s966_s3 + $0x50] sm:$0xff]  ;;  %v506_v25 = vld [vmem:[%s966_s3 + $0x48] sm:$0xff] }
  0x3c   :  { %723 = vmatpush3.msra.mxu1 %v144_v31  ;;  %689 = vmatprep.subr.mxu0 %v127_v32  ;;  %v505_v26 = vld [vmem:[%s966_s3 + $0x40] sm:$0xff]  ;;  %v504_v27 = vld [vmem:[%s966_s3 + $0x38] sm:$0xff]  ;;  %v503_v28 = vld [vmem:[%s966_s3 + $0x30] sm:$0xff] }
  0x3d   :  { %724 = vmatprep.subr.mxu1 %v159_v33  ;;  %690 = vmatpush3.msra.mxu0 %v111_v34  ;;  %v502_v29 = vld [vmem:[%s966_s3 + $0x28] sm:$0xff]  ;;  %v501_v30 = vld [vmem:[%s966_s3 + $0x20] sm:$0xff]  ;;  %v500_v31 = vld [vmem:[%s966_s3 + $0x18] sm:$0xff] }
  0x3e   :  { %725 = vmatpush3.msra.mxu1 %v143_v35  ;;  %691 = vmatprep.subr.mxu0 %v126_v36  ;;  %v499_v32 = vld [vmem:[%s966_s3 + $0x10] sm:$0xff]  ;;  %v498_v33 = vld [vmem:[%s966_s3 + $0x8] sm:$0xff]  ;;  %v497_v34 = vld [vmem:[%s966_s3] sm:$0xff] }
  0x3f   :  { %726 = vmatprep.subr.mxu1 %v158_v37  ;;  %692 = vmatpush3.msra.mxu0 %v110_v38 }
  0x40   :  { %727 = vmatpush3.msra.mxu1 %v142_v39  ;;  %693 = vmatprep.subr.mxu0 %v125_v40  ;;  %v607_v39 = vld [vmem:[%s965_s2] ss:$0 sm:$0xff]  ;;  %s860_s2 = smov [#allocation5]  }
  0x41   :  { %728 = vmatprep.subr.mxu1 %v157_v41  ;;  %694 = vmatpush3.msra.mxu0 %v109_v42  ;;  %s598_s10 = sshll.u32 %s860_s2, 4  ;;  %s599_s10 = int_to_ptr.vmem [resolvable:$true] %s598_s10 }
  0x42   :  { %729 = vmatpush3.msra.mxu1 %v141_v43  ;;  %695 = vmatprep.subr.mxu0 %v124_v44  ;;  %s830_s11 = scalar_lea.vmem %s599_s10, 32  ;;  %p835_p6 = scmp.lt.s32.totalorder %s599_s10, %s599_s10 }
  0x43   :  { %730 = vmatprep.subr.mxu1 %v156_v45  ;;  %696 = vmatpush3.msra.mxu0 %v108_v46  ;;  %p831_p5 = scmp.ne.s32.totalorder %s599_s10, %s830_s11  ;;  %p836_p7 = scmp.lt.s32.totalorder %s830_s11, %s830_s11 }
  0x44   :  { %731 = vmatpush3.msra.mxu1 %v140_v47  ;;  %697 = vmatprep.subr.mxu0 %v123_v48 }
  0x45   :  { %732 = vmatprep.subr.mxu1 %v155_v49  ;;  %698 = vmatpush3.msra.mxu0 %v107_v50  ;;  %p837_p8 = por %p836_p7, %p835_p6 }
  0x46   :  { %733 = vmatpush3.msra.mxu1 %v139_v52  ;;  %699 = vmatprep.subr.mxu0 %v122_v53 }
  0x47   :  { %734 = vmatprep.subr.mxu1 %v154_v54  ;;  %700 = vmatpush3.msra.mxu0 %v106_v56  ;;  %v608_v54 = vld [vmem:[%s967_s4] ss:$0 sm:$0xff]  ;;  %p838_p9 = pnand %p837_p8, %p831_p5 }
  0x48   :  { %735 = vmatpush3.msra.mxu1 %v138_v57  ;;  %701 = vmatprep.subr.mxu0 %v121_v58 }
  0x49   :  { %736 = vmatprep.subr.mxu1 %v153_v59  ;;  %702 = vmatpush3.msra.mxu0 %v105_v60 }
  0x4a   :  { %737 = vmatpush3.msra.mxu1 %v137_v61  ;;  %703 = vmatprep.subr.mxu0 %v120_v63 }
  0x4b   :  { %738 = vmatprep.subr.mxu1 %v152_v0  ;;  %704 = vmatpush3.msra.mxu0 %v104_v1 }
  0x4c   :  { %739 = vmatpush3.msra.mxu1 %v136_v2  ;;  %705 = vmatprep.subr.mxu0 %v119_v3 }
  0x4d   :  { %740 = vmatprep.subr.mxu1 %v151_v4  ;;  %706 = vmatpush3.msra.mxu0 %v103_v6 }
  0x4e   :  { %741 = vmatpush3.msra.mxu1 %v135_v7  ;;  %707 = vmatprep.subr.mxu0 %v118_v9 }
  0x4f   :  { %742 = vmatprep.subr.mxu1 %v150_v10  ;;  %708 = vmatpush3.msra.mxu0 %v102_v11 }
  0x50   :  { %743 = vmatpush3.msra.mxu1 %v134_v12  ;;  %709 = vmatprep.subr.mxu0 %v117_v13 }
  0x51   :  { %744 = vmatprep.subr.mxu1 %v149_v14  ;;  %710 = vmatpush3.msra.mxu0 %v101_v16 }
  0x52   :  { %420 = vmatprep.mubr.f32.mxu0 %v206_v15  ;;  %745 = vmatpush3.msra.mxu1 %v133_v51 }
  0x53   :  { %490 = vmatprep.mubr.f32.mxu1 %v207_v17  ;;  %421 = vmatmul.mubr.f32.vlgmr.msra.gmra.mxu0 %v198_v5 }
  0x54   :  { %491 = vmatmul.mubr.f32.vlgmr.msra.gmra.mxu1 %v205_v8  ;;  %766 = vmatprep.subr.mxu0 %v858_v19 }
  0x55   :  { %767 = vmatpush3.msra.mxu0 %v512_v18  ;;  %798 = vmatprep.mubr.msk.f32.mxu0 %vm859_vm0, %v858_v19 }
  0x56   :  { %768 = vmatprep.subr.mxu0 %v858_v19 }
  0x57   :  { %769 = vmatpush3.msra.mxu0 %v511_v20 }
  0x58   :  { %770 = vmatprep.subr.mxu0 %v858_v19 }
  0x59   :  { %771 = vmatpush3.msra.mxu0 %v510_v21 }
  0x5a   :  { %772 = vmatprep.subr.mxu0 %v858_v19 }
  0x5b   :  { %773 = vmatpush3.msra.mxu0 %v509_v22 }
  0x5c   :  { %774 = vmatprep.subr.mxu0 %v858_v19 }
  0x5d   :  { %775 = vmatpush3.msra.mxu0 %v508_v23 }
  0x5e   :  { %776 = vmatprep.subr.mxu0 %v858_v19 }
  0x5f   :  { %777 = vmatpush3.msra.mxu0 %v507_v24 }
  0x60   :  { %778 = vmatprep.subr.mxu0 %v858_v19 }
  0x61   :  { %779 = vmatpush3.msra.mxu0 %v506_v25 }
  0x62   :  { %780 = vmatprep.subr.mxu0 %v858_v19 }
  0x63   :  { %781 = vmatpush3.msra.mxu0 %v505_v26 }
  0x64   :  { %782 = vmatprep.subr.mxu0 %v858_v19 }
  0x65   :  { %783 = vmatpush3.msra.mxu0 %v504_v27 }
  0x66   :  { %784 = vmatprep.subr.mxu0 %v858_v19 }
  0x67   :  { %785 = vmatpush3.msra.mxu0 %v503_v28 }
  0x68   :  { %786 = vmatprep.subr.mxu0 %v858_v19 }
  0x69   :  { %787 = vmatpush3.msra.mxu0 %v502_v29 }
  0x6a   :  { %788 = vmatprep.subr.mxu0 %v858_v19 }
  0x6b   :  { %789 = vmatpush3.msra.mxu0 %v501_v30 }
  0x6c   :  { %790 = vmatprep.subr.mxu0 %v858_v19 }
  0x6d   :  { %791 = vmatpush3.msra.mxu0 %v500_v31 }
  0x6e   :  { %792 = vmatprep.subr.mxu0 %v858_v19 }
  0x6f   :  { %793 = vmatpush3.msra.mxu0 %v499_v32 }
  0x70   :  { %794 = vmatprep.subr.mxu0 %v858_v19 }
  0x71   :  { %795 = vmatpush3.msra.mxu0 %v498_v33 }
  0x72   :  { %796 = vmatprep.subr.mxu0 %v858_v19 }
  0x73   :  { %797 = vmatpush3.msra.mxu0 %v497_v34 }
  0xf1   :  { %v641_v35 = vpop.f32.mrf.mxu0 }
  0xf3   :  { %v676_v36 = vpop.f32.mrf.mxu1  ;;  %v642_v37 = vpop.f32.mrf.mxu0 }
  0xf4   :  { %v643_v38 = vadd.f32 %v642_v37, %v641_v35 }
  0xf5   :  { %v677_v40 = vpop.f32.mrf.mxu1 }
  0xf6   :  { %v283_v41 = vadd.f32 %v643_v38, %v607_v39  ;;  %v678_v42 = vadd.f32 %v677_v40, %v676_v36 }
  0xf8   :  { %v353_v47 = vadd.f32 %v678_v42, %v283_v41 }
 0x113   :  { %v711_v43 = vpop.f32.mrf.mxu0 }
 0x114   :  { %v746_v44 = vpop.f32.mrf.mxu1 }
 0x115   :  { %v712_v45 = vpop.f32.mrf.mxu0 }
 0x116   :  { %v747_v46 = vpop.f32.mrf.mxu1  ;;  %v713_v48 = vadd.f32 %v712_v45, %v711_v43 }
 0x117   :  { %v748_v50 = vadd.f32 %v747_v46, %v746_v44 }
 0x118   :  { %v423_v49 = vadd.f32 %v713_v48, %v353_v47 }
 0x11a   :  { %v493_v52 = vadd.f32 %v748_v50, %v423_v49 }
 0x11c   :  { %v496_v53 = vmax.f32 %v493_v52, 0.0 }
 0x11e   :  { %799 = vmatmul.mubr.f32.vlgmr.msra.gmra.mxu0 %v496_v53 }
 0x1de   :  { %v586_v55 = vpop.f32.mrf.mxu0 }
 0x1df   :  { %v587_v56 = vadd.f32 %v608_v54, %v586_v55 }
 0x1e0   :  { %v800_v57 = vpop.f32.mrf.mxu0 }
 0x1e1   :  { %v590_v58 = vmax.f32 %v587_v56, 0.0 }
 0x1e3   :  { %591 = vst [vmem:[#allocation5] sm:$0x3] %v590_v58 }
 0x1e4   :  { %841 = shalt.err (!%p838_p9)
}
 0x1e5   :  { %601 = dma.vmem_to_hbm [thread:$0]  %s599_s10, 32, %s968_s5, [#allocation4]  }
 0x1e6   :  { %852 = dma.done.wait [#allocation4], 32  }
 0x1e7   :  { %853 = vsyncadd [#allocation4], 4294967264 }
 0x1e8   :  { %605 = vsyncpa [#allocation3], 1 }
 0x1e9   :  { %606 = vsyncpa [#allocation4], 1 }

</bundles_post_ra>
